<compile_context>
chip_gen: v7x
topology: tpu7x:2x2x1
jax: 0.10.0
libtpu: 0.0.40
codegen_flags: <defaults>
</compile_context>

<pallas_src>
import functools

import jax
import jax.numpy as jnp
from jax import lax
from jax.experimental import pallas as pl
from jax.experimental.pallas import tpu as pltpu


def _usad_encoder_kernel(x_ref, w1_ref, b1_ref, w2_ref, b2_ref, w3_ref, b3_ref,
                         z_ref):
    """One batch tile. x arrives (tile_b, in_size) in caller layout; everything
    downstream is feature-major (features, tile_b): batch on the 128-lane axis."""
    x = x_ref[...].astype(w1_ref.dtype)          # f32 stream -> bf16 once, in-kernel
    # layer 1: contract in_size (dim 1 of both operands) -> (h1, tile_b)
    h1 = lax.dot_general(w1_ref[...], x, (((1,), (1,)), ((), ())),
                         preferred_element_type=jnp.float32)
    h1 = jnp.maximum(h1 + b1_ref[...], 0.0).astype(w2_ref.dtype)
    # layer 2: (h2, h1) @ (h1, tile_b) -> (h2, tile_b)
    h2 = jnp.dot(w2_ref[...], h1, preferred_element_type=jnp.float32)
    h2 = jnp.maximum(h2 + b2_ref[...], 0.0).astype(w3_ref.dtype)
    # layer 3: (latent, h2) @ (h2, tile_b) -> (latent, tile_b)
    z = jnp.dot(w3_ref[...], h2, preferred_element_type=jnp.float32)
    z_ref[...] = jnp.maximum(z + b3_ref[...], 0.0).astype(z_ref.dtype)


def prepare_params(params, compute_dtype=jnp.bfloat16):
    """One-time conversion of torch-convention params into kernel layout.

    Weights keep their (out_features, in_features) shape (the feature-major
    kernel needs no transpose); biases become (out_features, 1) and stay f32.
    Call ONCE at init, not per forward call.
    """
    return {
        "w1": params["w1"].astype(compute_dtype),
        "w2": params["w2"].astype(compute_dtype),
        "w3": params["w3"].astype(compute_dtype),
        "b1": params["b1"].reshape(-1, 1).astype(jnp.float32),
        "b2": params["b2"].reshape(-1, 1).astype(jnp.float32),
        "b3": params["b3"].reshape(-1, 1).astype(jnp.float32),
    }


def _round_up(x, m):
    return ((x + m - 1) // m) * m


def _pick_tiling(batch, in_size, h1, h2, latent, in_bytes, out_bytes):
    """Largest lane-dense batch tile within a conservative VMEM budget (safe on
    v7x's 64 MiB), capped at 1024, with >= 2 grid steps when batch >= 256 so
    v7x's two TensorCores both get work. Pure Python-int math (trace time)."""
    budget = 40 * 1024 * 1024
    resident = 2 * (h1 * in_size + h2 * h1 + latent * h2)   # bf16 weights, Buffered(1)
    resident += 4 * (h1 + h2 + latent)                      # f32 biases (out, 1)
    # per batch-column bytes: input (2 buffers), output (2 buffers), f32 intermediates
    per_col = (in_size * in_bytes * 2 + latent * out_bytes * 2
               + (h1 + h2 + latent) * 4)
    avail = max(budget - resident, per_col * 128)
    max_tile = min(max(128, (avail // per_col) // 128 * 128), 1024)

    padded = _round_up(batch, 128)
    min_steps = 2 if padded >= 256 else 1                   # v7x megacore split
    grid_b = max(min_steps, pl.cdiv(padded, max_tile))
    tile_b = _round_up(pl.cdiv(padded, grid_b), 128)
    grid_b = pl.cdiv(padded, tile_b)
    padded = grid_b * tile_b

    vmem_need = resident + per_col * tile_b
    # explicit scoped-VMEM limit: v5e default is only 16 MiB; keep <= 48 MiB for v7x
    vmem_limit = int(min(max(2 * vmem_need, 16 * 1024 * 1024), 48 * 1024 * 1024))
    return tile_b, grid_b, padded, vmem_limit


@functools.partial(jax.jit, static_argnames=("feature_major_out",))
def usad_encoder(x, kp, *, feature_major_out=False):
    """x: (batch, in_size). kp: output of prepare_params().
    Returns (batch, latent) in x.dtype, or (latent, batch) when
    feature_major_out=True (skips the final re-layout for downstream consumers
    that accept batch-on-lanes, e.g. a matching decoder kernel)."""
    batch, in_size = x.shape
    h1, h2, latent = kp["w1"].shape[0], kp["w2"].shape[0], kp["w3"].shape[0]
    out_dtype = x.dtype

    tile_b, grid_b, padded, vmem_limit = _pick_tiling(
        batch, in_size, h1, h2, latent,
        x.dtype.itemsize, jnp.dtype(out_dtype).itemsize)

    if padded != batch:       # pad op only materializes for ragged batch sizes
        x = jnp.pad(x, ((0, padded - batch), (0, 0)))

    flops = 2 * padded * (in_size * h1 + h1 * h2 + h2 * latent)
    bytes_accessed = (padded * in_size * x.dtype.itemsize
                      + sum(v.size * v.dtype.itemsize for v in kp.values())
                      + latent * padded * jnp.dtype(out_dtype).itemsize)

    def resident(arr):
        # Full-array block, constant index map, single-buffered: parameters sit
        # in VMEM once for the whole grid (halves resident footprint on v7x).
        return pl.BlockSpec(arr.shape, lambda i: (0, 0),
                            pipeline_mode=pl.Buffered(1))

    zt = pl.pallas_call(
        _usad_encoder_kernel,
        out_shape=jax.ShapeDtypeStruct((latent, padded), out_dtype),
        grid=(grid_b,),
        in_specs=[
            # streamed native-layout input tile (default double-buffered DMA)
            pl.BlockSpec((tile_b, in_size), lambda i: (i, 0)),
            resident(kp["w1"]), resident(kp["b1"]),
            resident(kp["w2"]), resident(kp["b2"]),
            resident(kp["w3"]), resident(kp["b3"]),
        ],
        out_specs=pl.BlockSpec((latent, tile_b), lambda i: (0, i)),
        compiler_params=pltpu.CompilerParams(
            dimension_semantics=("parallel",),   # v7x: shard batch over 2 TCs
            vmem_limit_bytes=vmem_limit),
        cost_estimate=pl.CostEstimate(
            flops=flops, bytes_accessed=bytes_accessed, transcendentals=0),
    )(x, kp["w1"], kp["b1"], kp["w2"], kp["b2"], kp["w3"], kp["b3"])

    if feature_major_out:
        return zt[:, :batch]
    return jnp.transpose(zt[:, :batch])


def init_params(key, in_size, latent_size):
    """Deterministic synthetic init matching nn.Linear parameter shapes."""
    h1 = in_size // 2
    h2 = in_size // 4
    ks = jax.random.split(key, 6)

    def uni(k, shape, fan_in):
        bound = 1.0 / jnp.sqrt(fan_in)
        return jax.random.uniform(k, shape, jnp.float32, -bound, bound)

    return {
        # torch convention: weight is (out_features, in_features)
        "w1": uni(ks[0], (h1, in_size), in_size),
        "b1": uni(ks[1], (h1,), in_size),
        "w2": uni(ks[2], (h2, h1), h1),
        "b2": uni(ks[3], (h2,), h1),
        "w3": uni(ks[4], (latent_size, h2), h2),
        "b3": uni(ks[5], (latent_size,), h2),
    }


def reference(x, p):
    h1 = jnp.maximum(x @ p["w1"].T + p["b1"], 0.0)
    h2 = jnp.maximum(h1 @ p["w2"].T + p["b2"], 0.0)
    return jnp.maximum(h2 @ p["w3"].T + p["b3"], 0.0)


if __name__ == "__main__":
    key = jax.random.PRNGKey(0)
    batch, in_size, latent_size = 512, 128, 16   # h1 = 64, h2 = 32
    k_x, k_p = jax.random.split(key)
    x = jax.random.normal(k_x, (batch, in_size), jnp.float32)
    params = init_params(k_p, in_size, latent_size)

    kparams = prepare_params(params)             # one-time layout/dtype prep
    z = usad_encoder(x, kparams)                 # adaptive batch tiles, grid >= 2
    jax.block_until_ready(z)

    z_ref = reference(x, params)                 # f32 reference (torch semantics)
    assert z.shape == (batch, latent_size)
    max_err = float(jnp.max(jnp.abs(z - z_ref)))
    # bf16 weights/activations on the MXU -> loose tolerance vs f32 reference
    assert jnp.allclose(z, z_ref, atol=5e-2, rtol=5e-2), f"max abs err {max_err}"
    print("KERNEL_OK")
</pallas_src>

<mosaic_0001>
module attributes {stable_mosaic.version = 11 : i64} {
  func.func @_usad_encoder_kernel(%arg0: i32, %arg1: memref<256x128xf32, #tpu.memory_space<vmem>>, %arg2: memref<64x128xbf16, #tpu.memory_space<vmem>>, %arg3: memref<64x1xf32, #tpu.memory_space<vmem>>, %arg4: memref<32x64xbf16, #tpu.memory_space<vmem>>, %arg5: memref<32x1xf32, #tpu.memory_space<vmem>>, %arg6: memref<16x32xbf16, #tpu.memory_space<vmem>>, %arg7: memref<16x1xf32, #tpu.memory_space<vmem>>, %arg8: memref<16x256xf32, #tpu.memory_space<vmem>>) attributes {dimension_semantics = [#tpu.dimension_semantics<parallel>], iteration_bounds = array<i64: 2>, scalar_prefetch = 0 : i64, scratch_operands = 0 : i64, tpu.core_type = #tpu.core_type<tc>, window_params = [{transform_indices = @transform_0, window_bounds = array<i64: 256, 128>}, {pipeline_mode = #tpu.pipeline_mode<synchronous>, transform_indices = @transform_1, window_bounds = array<i64: 64, 128>}, {pipeline_mode = #tpu.pipeline_mode<synchronous>, transform_indices = @transform_2, window_bounds = array<i64: 64, 1>}, {pipeline_mode = #tpu.pipeline_mode<synchronous>, transform_indices = @transform_3, window_bounds = array<i64: 32, 64>}, {pipeline_mode = #tpu.pipeline_mode<synchronous>, transform_indices = @transform_4, window_bounds = array<i64: 32, 1>}, {pipeline_mode = #tpu.pipeline_mode<synchronous>, transform_indices = @transform_5, window_bounds = array<i64: 16, 32>}, {pipeline_mode = #tpu.pipeline_mode<synchronous>, transform_indices = @transform_6, window_bounds = array<i64: 16, 1>}, {transform_indices = @transform_7, window_bounds = array<i64: 16, 256>}]} {
    %c0 = arith.constant 0 : index
    %c0_0 = arith.constant 0 : index
    %0 = vector.load %arg1[%c0, %c0_0] : memref<256x128xf32, #tpu.memory_space<vmem>>, vector<256x128xf32>
    %1 = arith.truncf %0 : vector<256x128xf32> to vector<256x128xbf16>
    %c0_1 = arith.constant 0 : index
    %c0_2 = arith.constant 0 : index
    %2 = vector.load %arg2[%c0_1, %c0_2] : memref<64x128xbf16, #tpu.memory_space<vmem>>, vector<64x128xbf16>
    %cst = arith.constant dense<0.000000e+00> : vector<64x256xf32>
    %3 = tpu.matmul %2, %1, %cst {dimension_numbers = #tpu.dot_dimension_numbers<[1], [1], [0], [0], [0, 0, 1, 0], [], []>} : vector<64x128xbf16>, vector<256x128xbf16>, vector<64x256xf32> -> vector<64x256xf32>
    %c0_3 = arith.constant 0 : index
    %c0_4 = arith.constant 0 : index
    %4 = vector.load %arg3[%c0_3, %c0_4] : memref<64x1xf32, #tpu.memory_space<vmem>>, vector<64x1xf32>
    %5 = vector.broadcast %4 : vector<64x1xf32> to vector<64x256xf32>
    %6 = arith.addf %3, %5 : vector<64x256xf32>
    %cst_5 = arith.constant 0.000000e+00 : f32
    %7 = vector.broadcast %cst_5 : f32 to vector<64x256xf32>
    %8 = arith.maximumf %6, %7 : vector<64x256xf32>
    %9 = arith.truncf %8 : vector<64x256xf32> to vector<64x256xbf16>
    %c0_6 = arith.constant 0 : index
    %c0_7 = arith.constant 0 : index
    %10 = vector.load %arg4[%c0_6, %c0_7] : memref<32x64xbf16, #tpu.memory_space<vmem>>, vector<32x64xbf16>
    %cst_8 = arith.constant dense<0.000000e+00> : vector<32x256xf32>
    %11 = tpu.matmul %10, %9, %cst_8 {dimension_numbers = #tpu.dot_dimension_numbers<[1], [0], [0], [1], [0, 0, 1, 1], [], []>} : vector<32x64xbf16>, vector<64x256xbf16>, vector<32x256xf32> -> vector<32x256xf32>
    %c0_9 = arith.constant 0 : index
    %c0_10 = arith.constant 0 : index
    %12 = vector.load %arg5[%c0_9, %c0_10] : memref<32x1xf32, #tpu.memory_space<vmem>>, vector<32x1xf32>
    %13 = vector.broadcast %12 : vector<32x1xf32> to vector<32x256xf32>
    %14 = arith.addf %11, %13 : vector<32x256xf32>
    %cst_11 = arith.constant 0.000000e+00 : f32
    %15 = vector.broadcast %cst_11 : f32 to vector<32x256xf32>
    %16 = arith.maximumf %14, %15 : vector<32x256xf32>
    %17 = arith.truncf %16 : vector<32x256xf32> to vector<32x256xbf16>
    %c0_12 = arith.constant 0 : index
    %c0_13 = arith.constant 0 : index
    %18 = vector.load %arg6[%c0_12, %c0_13] : memref<16x32xbf16, #tpu.memory_space<vmem>>, vector<16x32xbf16>
    %cst_14 = arith.constant dense<0.000000e+00> : vector<16x256xf32>
    %19 = tpu.matmul %18, %17, %cst_14 {dimension_numbers = #tpu.dot_dimension_numbers<[1], [0], [0], [1], [0, 0, 1, 1], [], []>} : vector<16x32xbf16>, vector<32x256xbf16>, vector<16x256xf32> -> vector<16x256xf32>
    %c0_15 = arith.constant 0 : index
    %c0_16 = arith.constant 0 : index
    %20 = vector.load %arg7[%c0_15, %c0_16] : memref<16x1xf32, #tpu.memory_space<vmem>>, vector<16x1xf32>
    %21 = vector.broadcast %20 : vector<16x1xf32> to vector<16x256xf32>
    %22 = arith.addf %19, %21 : vector<16x256xf32>
    %cst_17 = arith.constant 0.000000e+00 : f32
    %23 = vector.broadcast %cst_17 : f32 to vector<16x256xf32>
    %24 = arith.maximumf %22, %23 : vector<16x256xf32>
    %c0_18 = arith.constant 0 : index
    %c0_19 = arith.constant 0 : index
    %25 = vector.load %arg8[%c0_18, %c0_19] : memref<16x256xf32, #tpu.memory_space<vmem>>, vector<16x256xf32>
    tpu.vector_store %arg8[%c0_18, %c0_19], %24 {strides = array<i32>} : memref<16x256xf32, #tpu.memory_space<vmem>>, vector<16x256xf32>,
    return
  }
  func.func @transform_0(%arg0: i32) -> (i32, i32) {
    %c0_i32 = arith.constant 0 : i32
    %c0_i32_0 = arith.constant 0 : i32
    return %arg0, %c0_i32 : i32, i32
  }
  func.func @transform_1(%arg0: i32) -> (i32, i32) {
    %c0_i32 = arith.constant 0 : i32
    %c0_i32_0 = arith.constant 0 : i32
    %c0_i32_1 = arith.constant 0 : i32
    return %c0_i32, %c0_i32_0 : i32, i32
  }
  func.func @transform_2(%arg0: i32) -> (i32, i32) {
    %c0_i32 = arith.constant 0 : i32
    %c0_i32_0 = arith.constant 0 : i32
    %c0_i32_1 = arith.constant 0 : i32
    return %c0_i32, %c0_i32_0 : i32, i32
  }
  func.func @transform_3(%arg0: i32) -> (i32, i32) {
    %c0_i32 = arith.constant 0 : i32
    %c0_i32_0 = arith.constant 0 : i32
    %c0_i32_1 = arith.constant 0 : i32
    return %c0_i32, %c0_i32_0 : i32, i32
  }
  func.func @transform_4(%arg0: i32) -> (i32, i32) {
    %c0_i32 = arith.constant 0 : i32
    %c0_i32_0 = arith.constant 0 : i32
    %c0_i32_1 = arith.constant 0 : i32
    return %c0_i32, %c0_i32_0 : i32, i32
  }
  func.func @transform_5(%arg0: i32) -> (i32, i32) {
    %c0_i32 = arith.constant 0 : i32
    %c0_i32_0 = arith.constant 0 : i32
    %c0_i32_1 = arith.constant 0 : i32
    return %c0_i32, %c0_i32_0 : i32, i32
  }
  func.func @transform_6(%arg0: i32) -> (i32, i32) {
    %c0_i32 = arith.constant 0 : i32
    %c0_i32_0 = arith.constant 0 : i32
    %c0_i32_1 = arith.constant 0 : i32
    return %c0_i32, %c0_i32_0 : i32, i32
  }
  func.func @transform_7(%arg0: i32) -> (i32, i32) {
    %c0_i32 = arith.constant 0 : i32
    %c0_i32_0 = arith.constant 0 : i32
    return %c0_i32, %arg0 : i32, i32
  }
}

</mosaic_0001>

<bundles_post_ra>
// kernel: usad_encoder.1
= control target key start
LH: loop header
LB: loop body
LE: loop exit
PB: predicated region body
PF: predicated region fallthrough
CT: control target
= control target key end

     0   :  { %12 = vsyncpa [#allocation3], 0  ;;  %s1322_s0 = inlined_call_operand.hbm [shape: f32[512,128], index: 0, kind: input, shape index: {}]   ;;  %s1323_s1 = inlined_call_operand.vmem [shape: bf16[64,128], index: 1, kind: input, shape index: {}]   ;;  %s1324_s2 = inlined_call_operand.vmem [shape: f32[64,1], index: 2, kind: input, shape index: {}]   ;;  %s1325_s3 = inlined_call_operand.vmem [shape: bf16[32,64], index: 3, kind: input, shape index: {}]   ;;  %s1326_s4 = inlined_call_operand.vmem [shape: f32[32,1], index: 4, kind: input, shape index: {}]   ;;  %s1327_s5 = inlined_call_operand.vmem [shape: bf16[16,32], index: 5, kind: input, shape index: {}]   ;;  %s1328_s6 = inlined_call_operand.vmem [shape: f32[16,1], index: 6, kind: input, shape index: {}]   ;;  %s1329_s7 = inlined_call_operand.hbm [shape: f32[16,512], index: 7, kind: output, shape index: {}]  }
   0x1   :  { %14 = vsyncpa [#allocation3 + $0x1], 0 }
   0x2   :  { %15 = vsyncpa [#allocation4], 0 }
   0x3   :  { %17 = vsyncpa [#allocation4 + $0x1], 0  ;;  %s1053_s24 = smov 0   ;;  %s1055_s25 = smov 0  }
   0x4   :  { %s1057_s26 = smov 0   ;;  %s1059_s27 = smov 0  }
   0x5 LB: > { %s1074_s28 = sadd.s32 4294967295, %s1003_s27   ;;  %s796_s29 = sadd.s32 4294967294, %s1003_s27   ;;  %s1003_s27 = sphi %s1059_s27, %s1342_s27   ;;  %s999_s26 = sphi %s1057_s26, %s1341_s26   ;;  %s995_s25 = sphi %s1055_s25, %s1340_s25   ;;  %s991_s24 = sphi %s1053_s24, %s1339_s24  }
   0x6   : > { %s1078_s30 = sadd.s32 1, %s1003_s27   ;;  %s30_s8 = sadd.s32 1, %s999_s26 }
   0x7   : > { %s27_s9 = ssub.s32 %s1003_s27, %s1078_s30  ;;  %p37_p0 = scmp.ne.s32.totalorder %s999_s26, %s995_s25 }
   0x8   : > { %p28_p1 = scmp.eq.s32.totalorder %s27_s9, 0  ;;  %p38_p2 = scmp.eq.s32.totalorder %s1003_s27, 0 }
   0x9   : > { %p43_p3 = scmp.ne.s32.totalorder %s995_s25, %s991_s24  ;;  %p44_p4 = scmp.eq.s32.totalorder %s1074_s28, 0 }
   0xa   : > { %s1090_s10 = scalar_select %p28_p1, %s999_s26, %s30_s8  }
   0xb   : > { %p1092_p5 = por %p38_p2, %p37_p0  ;;  %p1096_p6 = por %p44_p4, %p43_p3 }
   0xc   : > { %p193_p7 = scmp.eq.s32.totalorder %s1074_s28, 1  ;;  %p199_p8 = scmp.eq.s32.totalorder %s796_s29, 1 }
   0xd   : > { %p858_p10 = scmp.lt.s32.totalorder %s1003_s27, 2  ;;  %s237_s15 = sand.u32 1, %s999_s26  }
   0xe   : > { %p1103_p11 = por %p193_p7, %p37_p0  ;;  %p1107_p12 = por %p199_p8, %p43_p3 }
   0xf   : > { %s820_s16 = sshll.u32 %s1003_s27, 12  ;;  %s799_s17 = sshll.u32 %s237_s15, 8 }
  0x10   : > { %s1333_s13 = scalar_select %p1103_p11, 1, 0 }
  0x11   : > { %s1334_s14 = scalar_select %p1107_p12, 1, 0 }
  0x12   : > { %s1116_s20 = scalar_lea.hbm %s1322_s0, %s820_s16  ;;  %s241_s21 = scalar_lea.vmem [#allocation2], %s799_s17 }
  0x13   : > { %s248_s22 = sshll.u32 %s241_s21, 4  ;;  %p1120_p13 = pnand %p858_p10, %p1092_p5  ;;  %s1124_s22 = int_to_ptr.vmem [resolvable:$true] %s248_s22 }
  0x14   : > { %s1126_s29 = scalar_lea.sflag [#allocation3], %s237_s15  ;;  %s907_s8 = scalar_lea.hbm %s1116_s20, 4096 }
  0x15   : > { %p908_p0 = scmp.ne.s32.totalorder %s1116_s20, %s907_s8  ;;  %p909_p1 = pneg %p1120_p13 }
  0x16   : > { %s912_s16 = scalar_lea.hbm %s1322_s0, 8192  ;;  %p913_p4 = scmp.lt.u32.totalorder %s1116_s20, %s1322_s0 }
  0x17   : > { %p910_p2 = pnand %p909_p1, %p908_p0  ;;  %p914_p5 = scmp.lt.u32.totalorder %s912_s16, %s907_s8 }
  0x18   : > { %p916_p8 = scmp.lt.u32.totalorder %s907_s8, %s1116_s20 }
  0x19   : > { %p911_p3 = pneg %p910_p2  ;;  %p915_p7 = por %p914_p5, %p913_p4 }
  0x1b   : > { %p917_p10 = por %p916_p8, %p915_p7 }
  0x1d   : > { %p918_p9 = pnand %p917_p10, %p911_p3 }
  0x1f   : > { %921 = shalt.err (!%p918_p9)
}
  0x20   : > { %s922_s15 = scalar_lea.vmem %s1124_s22, 4096  ;;  %s1005_s19 = smov [#allocation2]  }
  0x21   : > { %p923_p0 = scmp.ne.s32.totalorder %s1124_s22, %s922_s15  ;;  %s927_s21 = sshll.u32 %s1005_s19, 4  ;;  %s928_s21 = int_to_ptr.vmem [resolvable:$false] %s927_s21 }
  0x22   : > { %s929_s9 = scalar_lea.vmem %s928_s21, 8192  ;;  %p930_p11 = scmp.lt.s32.totalorder %s1124_s22, %s928_s21 }
  0x23   : > { %p925_p2 = pnand %p923_p0, %p909_p1  ;;  %p931_p4 = scmp.lt.s32.totalorder %s929_s9, %s922_s15 }
  0x25   : > { %p926_p12 = pneg %p925_p2  ;;  %p932_p5 = por %p931_p4, %p930_p11 }
  0x27   : > { %p933_p7 = pnand %p932_p5, %p926_p12 }
  0x29   : > { %936 = shalt.err (!%p933_p7)
}
  0x2a   : > { %s1006_s8 = smov 128   ;;  %s1007_s11 = smov 8  }
  0x2b   : > { %853 = dma.hbm_to_vmem [thread:$0]  (!%p1120_p13), %s1116_s20, 4096, %s1124_s22, %s1126_s29, %s1006_s8, %s1006_s8, %s1007_s11  }
  0x2c   : > { %p802_p9 = scmp.ge.s32.totalorder %s1003_s27, 1  ;;  %p256_p1 = scmp.lt.s32.totalorder %s1003_s27, 3 }
  0x2e   : > { %p257_p3 = pnand %p802_p9, %p256_p1 }
  0x2f   : > { %s1157_s16 = sand.u32 (!%p257_p3), 1, %s995_s25  }
  0x30   : > { %260 = sbr.rel (%p257_p3) target bundleno = 840 (0x348), region = 48  ;;  %s803_s17 = sshll.u32 (!%p257_p3), %s1157_s16, 8 }
  0x31   : > { %s263_s18 = scalar_lea.sflag (!%p257_p3), [#allocation3], %s1157_s16  ;;  %s1161_s15 = scalar_lea.vmem (!%p257_p3), [#allocation2], %s803_s17 }
  0x37   : > { %982 = dma.done.wait (%p1096_p6), %s263_s18, 4096  }
  0x38   : > { %984 = vsyncadd (%p1096_p6), %s263_s18, 4294963200  ;;  %v1008_v0 = vmov 0   ;;  %v316_v1 = vld [vmem:[%s1161_s15 + $0x80] sm:$0xff]  ;;  %v317_v2 = vld [vmem:[%s1161_s15 + $0x88] sm:$0xff]  ;;  %vm563_vm0 = vcmask 523264   ;;  %vm654_vm1 = vcmask 261120  }
  0x39   : > { %898 = vset.pattern.permute.xlu0 %v1008_v0  ;;  %899 = vset.pattern.permute.xlu1 %v1008_v0  ;;  %v300_v3 = vld [vmem:[%s1161_s15] sm:$0xff]  ;;  %v340_v4 = vpack.c.bf16 %v317_v2, %v316_v1  ;;  %v301_v5 = vld [vmem:[%s1161_s15 + $0x8] sm:$0xff]  ;;  %v318_v6 = vld [vmem:[%s1161_s15 + $0x90] sm:$0xff]  ;;  %s804_s19 = sshll.u32 %s1157_s16, 5  ;;  %s821_s8 = sshll.u32 %s1074_s28, 8 }
  0x3a   : > { %602 = vmatprep.mubr.bf16.mxu1 %v1008_v0  ;;  %v319_v7 = vld [vmem:[%s1161_s15 + $0x98] sm:$0xff]  ;;  %v332_v8 = vpack.c.bf16 %v301_v5, %v300_v3  ;;  %v302_v10 = vld [vmem:[%s1161_s15 + $0x10] sm:$0xff]  ;;  %v320_v12 = vld [vmem:[%s1161_s15 + $0xa0] sm:$0xff]  ;;  %s296_s21 = scalar_lea.vmem [#allocation5], %s804_s19  ;;  %s1278_s18 = scalar_lea.hbm %s1329_s7, %s821_s8 }
  0x3b   : > { %v341_v9 = vpack.c.bf16 %v319_v7, %v318_v6  ;;  %822 = vmatprep.subr.bf16.mxu0 %v340_v4  ;;  %v303_v11 = vld [vmem:[%s1161_s15 + $0x18] sm:$0xff]  ;;  %v321_v13 = vld [vmem:[%s1161_s15 + $0xa8] sm:$0xff]  ;;  %v304_v16 = vld [vmem:[%s1161_s15 + $0x20] sm:$0xff]  ;;  %s723_s9 = sshll.u32 %s296_s21, 4  ;;  %s710_s28 = scalar_lea.sflag [#allocation4], %s1157_s16  ;;  %s1273_s9 = int_to_ptr.vmem [resolvable:$true] %s723_s9 }
  0x3c   : > { %823 = vmatpush3.bf16.xpose.msra.mxu0 %v332_v8  ;;  %v333_v14 = vpack.c.bf16 %v303_v11, %v302_v10  ;;  %v342_v15 = vpack.c.bf16 %v321_v13, %v320_v12  ;;  %v1184_v17 = vld [vmem:[%s1323_s1] sm:$0xff]   ;;  %v305_v18 = vld [vmem:[%s1161_s15 + $0x28] sm:$0xff]  ;;  %v322_v19 = vld [vmem:[%s1161_s15 + $0xb0] sm:$0xff]  ;;  %p1336_p11 = scmp.ne.s32.totalorder %s1333_s13, 0  ;;  %s1009_s12 = smov [#allocation5]  }
  0x3d   : > { %824 = vmatprep.subr.bf16.mxu0 %v341_v9  ;;  %838 = vmatprep.mubr.bf16.mxu0 %v1184_v17  ;;  %v323_v20 = vld [vmem:[%s1161_s15 + $0xb8] sm:$0xff]  ;;  %v356_v21 = vld [vmem:[%s1324_s2] sm:$0xff]  ;;  %v358_v22 = vld [vmem:[%s1324_s2 + $0x10] sm:$0xff]  ;;  %v334_v23 = vpack.c.bf16 %v305_v18, %v304_v16  ;;  %s941_s20 = sshll.u32 %s1009_s12, 4  ;;  %s942_s20 = int_to_ptr.vmem [resolvable:$false] %s941_s20 }
  0x3e   : > { %366 = vperm.xlu0 %898, %v356_v21   ;;  %376 = vperm.xlu1 %899, %v358_v22   ;;  %v357_v24 = vld [vmem:[%s1324_s2 + $0x8] sm:$0xff]  ;;  %v343_v25 = vpack.c.bf16 %v323_v20, %v322_v19  ;;  %v359_v26 = vld [vmem:[%s1324_s2 + $0x18] sm:$0xff]  ;;  %v306_v27 = vld [vmem:[%s1161_s15 + $0x30] sm:$0xff]  ;;  %s943_s22 = scalar_lea.vmem %s942_s20, 1024  ;;  %p944_p8 = scmp.lt.s32.totalorder %s1273_s9, %s942_s20 }
  0x3f   : > { %v360_v28 = vld [vmem:[%s1324_s2 + $0x20] sm:$0xff]  ;;  %v307_v29 = vld [vmem:[%s1161_s15 + $0x38] sm:$0xff]  ;;  %v361_v30 = vld [vmem:[%s1324_s2 + $0x28] sm:$0xff] }
  0x40   : > { %v324_v31 = vld [vmem:[%s1161_s15 + $0xc0] sm:$0xff]  ;;  %v325_v32 = vld [vmem:[%s1161_s15 + $0xc8] sm:$0xff]  ;;  %v335_v33 = vpack.c.bf16 %v307_v29, %v306_v27  ;;  %v362_v34 = vld [vmem:[%s1324_s2 + $0x30] sm:$0xff] }
  0x41   : > { %v344_v35 = vpack.c.bf16 %v325_v32, %v324_v31  ;;  %v363_v36 = vld [vmem:[%s1324_s2 + $0x38] sm:$0xff]  ;;  %v529_v37 = vld [vmem:[%s1326_s4] sm:$0xff]  ;;  %v309_v39 = vld [vmem:[%s1161_s15 + $0x48] sm:$0xff] }
  0x42   : > { %371 = vperm.xlu0 %898, %v357_v24   ;;  %381 = vperm.xlu1 %899, %v359_v26   ;;  %v308_v38 = vld [vmem:[%s1161_s15 + $0x40] sm:$0xff]  ;;  %v530_v40 = vld [vmem:[%s1326_s4 + $0x8] sm:$0xff]  ;;  %v326_v41 = vld [vmem:[%s1161_s15 + $0xd0] sm:$0xff] }
  0x43   : > { %v327_v42 = vld [vmem:[%s1161_s15 + $0xd8] sm:$0xff]  ;;  %v336_v43 = vpack.c.bf16 %v309_v39, %v308_v38  ;;  %v531_v44 = vld [vmem:[%s1326_s4 + $0x10] sm:$0xff]  ;;  %v637_v47 = vld [vmem:[%s1328_s6] sm:$0xff] }
  0x44   : > { %825 = vmatpush3.bf16.xpose.msra.mxu0 %v333_v14  ;;  %v345_v45 = vpack.c.bf16 %v327_v42, %v326_v41  ;;  %v532_v46 = vld [vmem:[%s1326_s4 + $0x18] sm:$0xff]  ;;  %v310_v48 = vld [vmem:[%s1161_s15 + $0x50] sm:$0xff]  ;;  %v638_v50 = vld [vmem:[%s1328_s6 + $0x8] sm:$0xff] }
  0x45   : > { %826 = vmatprep.subr.bf16.mxu0 %v342_v15  ;;  %v311_v49 = vld [vmem:[%s1161_s15 + $0x58] sm:$0xff]  ;;  %v328_v51 = vld [vmem:[%s1161_s15 + $0xe0] sm:$0xff]  ;;  %v329_v52 = vld [vmem:[%s1161_s15 + $0xe8] sm:$0xff] }
  0x46   : > { %386 = vperm.xlu0 %898, %v360_v28   ;;  %391 = vperm.xlu1 %899, %v361_v30   ;;  %v337_v53 = vpack.c.bf16 %v311_v49, %v310_v48  ;;  %v346_v54 = vpack.c.bf16 %v329_v52, %v328_v51  ;;  %v312_v55 = vld [vmem:[%s1161_s15 + $0x60] sm:$0xff]  ;;  %v313_v56 = vld [vmem:[%s1161_s15 + $0x68] sm:$0xff]  ;;  %v330_v57 = vld [vmem:[%s1161_s15 + $0xf0] sm:$0xff] }
  0x47   : > { %v331_v58 = vld [vmem:[%s1161_s15 + $0xf8] sm:$0xff]  ;;  %v338_v59 = vpack.c.bf16 %v313_v56, %v312_v55  ;;  %v314_v61 = vld [vmem:[%s1161_s15 + $0x70] sm:$0xff]  ;;  %v901_v1 = vld [vmem:[%s1323_s1 + $0x8] sm:$0xff]  }
  0x48   : > { %v347_v60 = vpack.c.bf16 %v331_v58, %v330_v57  ;;  %v315_v62 = vld [vmem:[%s1161_s15 + $0x78] sm:$0xff]  ;;  %v902_v2 = vld [vmem:[%s1323_s1 + $0x10] sm:$0xff]   ;;  %s937_s15 = scalar_lea.vmem %s1273_s9, 512 }
  0x49   : > { %v339_v63 = vpack.c.bf16 %v315_v62, %v314_v61  ;;  %v903_v3 = vld [vmem:[%s1323_s1 + $0x18] sm:$0xff]   ;;  %p938_p6 = scmp.ne.s32.totalorder %s1273_s9, %s937_s15  ;;  %p945_p10 = scmp.lt.s32.totalorder %s943_s22, %s937_s15 }
  0x4a   : > { %396 = vperm.xlu0 %898, %v362_v34   ;;  %401 = vperm.xlu1 %899, %v363_v36  }
  0x4b   : > { %p939_p12 = pnand %p938_p6, %p1336_p11  ;;  %p946_p0 = por %p945_p10, %p944_p8 }
  0x4c   : > { %827 = vmatpush3.bf16.xpose.msra.mxu0 %v334_v23 }
  0x4d   : > { %828 = vmatprep.subr.bf16.mxu0 %v343_v25  ;;  %p940_p13 = pneg %p939_p12 }
  0x4e   : > { %535 = vperm.xlu0 %898, %v529_v37   ;;  %540 = vperm.xlu1 %899, %v530_v40  }
  0x4f   : > { %p947_p2 = pnand %p946_p0, %p940_p13 }
  0x52   : > { %545 = vperm.xlu0 %898, %v531_v44   ;;  %550 = vperm.xlu1 %899, %v532_v46  }
  0x54   : > { %829 = vmatpush3.bf16.xpose.msra.mxu0 %v335_v33 }
  0x55   : > { %830 = vmatprep.subr.bf16.mxu0 %v344_v35 }
  0x56   : > { %641 = vperm.xlu0 %898, %v637_v47   ;;  %646 = vperm.xlu1 %899, %v638_v50  }
  0x5c   : > { %831 = vmatpush3.bf16.xpose.msra.mxu0 %v336_v43 }
  0x5d   : > { %832 = vmatprep.subr.bf16.mxu0 %v345_v45 }
  0x64   : > { %833 = vmatpush3.bf16.xpose.msra.mxu0 %v337_v53 }
  0x65   : > { %834 = vmatprep.subr.bf16.mxu0 %v346_v54 }
  0x6c   : > { %835 = vmatpush3.bf16.xpose.msra.mxu0 %v338_v59 }
  0x6d   : > { %836 = vmatprep.subr.bf16.mxu0 %v347_v60 }
  0x74   : > { %837 = vmatpush3.bf16.xpose.msra.mxu0 %v339_v63 }
  0x7b   : > { %839 = vmatmul.mubr.bf16.vlgmr.msra.gmra.mrb[0].mxu0 %v1184_v17 }
  0x7c   : > { %840 = vmatprep.mubr.bf16.mxu0 %v901_v1 }
  0x83   : > { %841 = vmatmul.mubr.bf16.gmra.mrb[4].mxu0 %v901_v1 }
  0x84   : > { %842 = vmatprep.mubr.bf16.mxu0 %v902_v2 }
  0x8b   : > { %843 = vmatmul.mubr.bf16.gmra.mrb[8].mxu0 %v902_v2 }
  0x8c   : > { %844 = vmatprep.mubr.bf16.mxu0 %v903_v3 }
  0x93   : > { %845 = vmatmul.mubr.bf16.gmra.mrb[12].mxu0 %v903_v3 }
  0xbd   : > { %v367_v4 = vpop.permute.xlu0 %366  ;;  %v377_v13 = vpop.permute.xlu1 %376 }
  0xc1   : > { %v372_v8 = vpop.permute.xlu0 %371  ;;  %v382_v24 = vpop.permute.xlu1 %381 }
  0xc5   : > { %v387_v35 = vpop.permute.xlu0 %386  ;;  %v392_v40 = vpop.permute.xlu1 %391 }
  0xc9   : > { %v397_v51 = vpop.permute.xlu0 %396  ;;  %v402_v56 = vpop.permute.xlu1 %401 }
 0x14e   : > { %v462_v5 = vpop.f32.mrb[0].mxu0 }
 0x14f   : > { %v463_v6 = vadd.f32 %v462_v5, %v367_v4  ;;  %v464_v7 = vpop.f32.mrb[1].mxu0  ;;  %v904_v5 = vld [vmem:[%s1325_s3] sm:$0xff]  }
 0x150   : > { %v465_v9 = vadd.f32 %v464_v7, %v367_v4  ;;  %v466_v10 = vpop.f32.mrb[2].mxu0  ;;  %v536_v7 = vpop.permute.xlu0 %535 }
 0x151   : > { %v467_v11 = vadd.f32 %v466_v10, %v372_v8  ;;  %v468_v12 = vpop.f32.mrb[3].mxu0  ;;  %v501_v15 = vmax.f32 %v463_v6, 0.0  ;;  %v905_v6 = vld [vmem:[%s1325_s3 + $0x8] sm:$0xff]  }
 0x152   : > { %v469_v14 = vadd.f32 %v468_v12, %v372_v8  ;;  %v502_v17 = vmax.f32 %v465_v9, 0.0 }
 0x153   : > { %v503_v16 = vmax.f32 %v467_v11, 0.0  ;;  %v541_v11 = vpop.permute.xlu1 %540 }
 0x154   : > { %v504_v18 = vmax.f32 %v469_v14, 0.0 }
 0x155   : > { %v517_v19 = vpack.c.bf16 %v503_v16, %v501_v15 }
 0x156   : > { %v472_v20 = vpop.f32.mrb[4].mxu0  ;;  %v518_v21 = vpack.c.bf16 %v504_v18, %v502_v17 }
 0x157   : > { %v473_v22 = vadd.f32 %v472_v20, %v377_v13  ;;  %v474_v23 = vpop.f32.mrb[5].mxu0 }
 0x158   : > { %v475_v25 = vadd.f32 %v474_v23, %v377_v13  ;;  %v476_v26 = vpop.f32.mrb[6].mxu0  ;;  %570 = vmatprep.subr.bf16.mxu1 %v518_v21 }
 0x159   : > { %v477_v27 = vadd.f32 %v476_v26, %v382_v24  ;;  %v478_v28 = vpop.f32.mrb[7].mxu0  ;;  %571 = vmatpush1.bf16.msra.mxu1 %v517_v19  ;;  %v505_v30 = vmax.f32 %v473_v22, 0.0  ;;  %v546_v22 = vpop.permute.xlu0 %545 }
 0x15a   : > { %v479_v29 = vadd.f32 %v478_v28, %v382_v24  ;;  %v506_v32 = vmax.f32 %v475_v25, 0.0  ;;  %v551_v26 = vpop.permute.xlu1 %550 }
 0x15b   : > { %v507_v31 = vmax.f32 %v477_v27, 0.0 }
 0x15c   : > { %v508_v33 = vmax.f32 %v479_v29, 0.0 }
 0x15d   : > { %v519_v34 = vpack.c.bf16 %v507_v31, %v505_v30 }
 0x15e   : > { %v520_v36 = vpack.c.bf16 %v508_v33, %v506_v32  ;;  %v482_v37 = vpop.f32.mrb[8].mxu0 }
 0x15f   : > { %v483_v38 = vadd.f32 %v482_v37, %v387_v35  ;;  %v484_v39 = vpop.f32.mrb[9].mxu0 }
 0x160   : > { %v485_v41 = vadd.f32 %v484_v39, %v387_v35  ;;  %v486_v42 = vpop.f32.mrb[10].mxu0  ;;  %572 = vmatprep.subr.bf16.mxu1 %v520_v36  ;;  %v642_v39 = vpop.permute.xlu0 %641 }
 0x161   : > { %v487_v43 = vadd.f32 %v486_v42, %v392_v40  ;;  %v488_v44 = vpop.f32.mrb[11].mxu0  ;;  %573 = vmatpush1.bf16.msra.mxu1 %v519_v34  ;;  %v509_v46 = vmax.f32 %v483_v38, 0.0  ;;  %v906_v38 = vld [vmem:[%s1327_s5] sm:$0xff]  }
 0x162   : > { %v489_v45 = vadd.f32 %v488_v44, %v392_v40  ;;  %v510_v48 = vmax.f32 %v485_v41, 0.0 }
 0x163   : > { %v511_v47 = vmax.f32 %v487_v43, 0.0  ;;  %v647_v43 = vpop.permute.xlu1 %646 }
 0x164   : > { %v512_v49 = vmax.f32 %v489_v45, 0.0 }
 0x165   : > { %v521_v50 = vpack.c.bf16 %v511_v47, %v509_v46 }
 0x166   : > { %v522_v52 = vpack.c.bf16 %v512_v49, %v510_v48  ;;  %v492_v53 = vpop.f32.mrb[12].mxu0 }
 0x167   : > { %v493_v54 = vadd.f32 %v492_v53, %v397_v51  ;;  %v494_v55 = vpop.f32.mrb[13].mxu0 }
 0x168   : > { %v495_v57 = vadd.f32 %v494_v55, %v397_v51  ;;  %v496_v58 = vpop.f32.mrb[14].mxu0  ;;  %574 = vmatprep.subr.bf16.mxu1 %v522_v52 }
 0x169   : > { %v497_v59 = vadd.f32 %v496_v58, %v402_v56  ;;  %v498_v60 = vpop.f32.mrb[15].mxu0  ;;  %575 = vmatpush1.bf16.msra.mxu1 %v521_v50  ;;  %v513_v62 = vmax.f32 %v493_v54, 0.0 }
 0x16a   : > { %v499_v61 = vadd.f32 %v498_v60, %v402_v56  ;;  %v514_v1 = vmax.f32 %v495_v57, 0.0 }
 0x16b   : > { %v515_v63 = vmax.f32 %v497_v59, 0.0 }
 0x16c   : > { %v516_v2 = vmax.f32 %v499_v61, 0.0 }
 0x16d   : > { %v523_v3 = vpack.c.bf16 %v515_v63, %v513_v62 }
 0x16e   : > { %v524_v4 = vpack.c.bf16 %v516_v2, %v514_v1 }
 0x170   : > { %576 = vmatprep.subr.bf16.mxu1 %v524_v4 }
 0x171   : > { %577 = vmatpush1.bf16.msra.mxu1 %v523_v3 }
 0x174   : > { %811 = vmatmul.mubr.msk.bf16.vlgmr.msra.gmra.mrb[0].mxu1 %vm563_vm0, %v904_v5 }
 0x175   : > { %612 = vmatprep.mubr.bf16.mxu1 %v1008_v0 }
 0x17c   : > { %812 = vmatmul.mubr.msk.bf16.gmra.mrb[4].mxu1 %vm563_vm0, %v905_v6 }
 0x17d   : > { %690 = vmatprep.mubr.bf16.mxu1 %v1008_v0 }
 0x247   : > { %v604_v8 = vpop.f32.mrb[0].mxu1 }
 0x248   : > { %v605_v9 = vadd.f32 %v604_v8, %v536_v7  ;;  %v606_v10 = vpop.f32.mrb[1].mxu1 }
 0x249   : > { %v607_v12 = vadd.f32 %v606_v10, %v536_v7  ;;  %v608_v13 = vpop.f32.mrb[2].mxu1 }
 0x24a   : > { %v609_v14 = vadd.f32 %v608_v13, %v541_v11  ;;  %v610_v15 = vpop.f32.mrb[3].mxu1  ;;  %v623_v17 = vmax.f32 %v605_v9, 0.0 }
 0x24b   : > { %v611_v16 = vadd.f32 %v610_v15, %v541_v11  ;;  %v624_v19 = vmax.f32 %v607_v12, 0.0 }
 0x24c   : > { %v625_v18 = vmax.f32 %v609_v14, 0.0 }
 0x24d   : > { %v626_v20 = vmax.f32 %v611_v16, 0.0 }
 0x24e   : > { %v631_v21 = vpack.c.bf16 %v625_v18, %v623_v17 }
 0x24f   : > { %v632_v23 = vpack.c.bf16 %v626_v20, %v624_v19  ;;  %v614_v24 = vpop.f32.mrb[4].mxu1 }
 0x250   : > { %v615_v25 = vadd.f32 %v614_v24, %v546_v22  ;;  %v616_v0 = vpop.f32.mrb[5].mxu1 }
 0x251   : > { %v617_v27 = vadd.f32 %v616_v0, %v546_v22  ;;  %v618_v28 = vpop.f32.mrb[6].mxu1  ;;  %658 = vmatprep.subr.bf16.mxu1 %v632_v23 }
 0x252   : > { %v619_v29 = vadd.f32 %v618_v28, %v551_v26  ;;  %v620_v30 = vpop.f32.mrb[7].mxu1  ;;  %659 = vmatpush1.bf16.msra.mxu1 %v631_v21  ;;  %v627_v32 = vmax.f32 %v615_v25, 0.0 }
 0x253   : > { %v621_v31 = vadd.f32 %v620_v30, %v551_v26  ;;  %v628_v34 = vmax.f32 %v617_v27, 0.0 }
 0x254   : > { %v629_v33 = vmax.f32 %v619_v29, 0.0 }
 0x255   : > { %v630_v35 = vmax.f32 %v621_v31, 0.0 }
 0x256   : > { %v633_v36 = vpack.c.bf16 %v629_v33, %v627_v32 }
 0x257   : > { %v634_v37 = vpack.c.bf16 %v630_v35, %v628_v34 }
 0x259   : > { %660 = vmatprep.subr.bf16.mxu1 %v634_v37 }
 0x25a   : > { %661 = vmatpush1.bf16.msra.mxu1 %v633_v36 }
 0x25d   : > { %814 = vmatmul.mubr.msk.bf16.vlgmr.msra.gmra.mrb[8].mxu1 %vm654_vm1, %v906_v38 }
 0x330   : > { %v692_v40 = vpop.f32.mrb[8].mxu1 }
 0x331   : > { %v693_v41 = vadd.f32 %v692_v40, %v642_v39  ;;  %v694_v42 = vpop.f32.mrb[9].mxu1 }
 0x332   : > { %v695_v44 = vadd.f32 %v694_v42, %v642_v39  ;;  %v696_v45 = vpop.f32.mrb[10].mxu1 }
 0x333   : > { %v701_v46 = vmax.f32 %v693_v41, 0.0  ;;  %v697_v47 = vadd.f32 %v696_v45, %v647_v43  ;;  %v698_v48 = vpop.f32.mrb[11].mxu1 }
 0x334   : > { %v702_v49 = vmax.f32 %v695_v44, 0.0  ;;  %v699_v50 = vadd.f32 %v698_v48, %v647_v43 }
 0x335   : > { %705 = vst [vmem:[%s296_s21] sm:$0xff] %v701_v46  ;;  %v703_v51 = vmax.f32 %v697_v47, 0.0 }
 0x336   : > { %706 = vst [vmem:[%s296_s21 + $0x8] sm:$0xff] %v702_v49  ;;  %v704_v52 = vmax.f32 %v699_v50, 0.0 }
 0x337   : > { %707 = vst [vmem:[%s296_s21 + $0x10] sm:$0xff] %v703_v51 }
 0x338   : > { %708 = vst [vmem:[%s296_s21 + $0x18] sm:$0xff] %v704_v52 }
 0x339   : > { %950 = shalt.err (!%p947_p2)
}
 0x33a   : > { %s951_s23 = scalar_lea.hbm %s1278_s18, 512  ;;  %s955_s21 = scalar_lea.hbm %s1329_s7, 1024 }
 0x33b   : > { %p952_p4 = scmp.ne.s32.totalorder %s1278_s18, %s951_s23  ;;  %p956_p9 = scmp.lt.u32.totalorder %s1278_s18, %s1329_s7 }
 0x33c   : > { %p957_p1 = scmp.lt.u32.totalorder %s955_s21, %s951_s23  ;;  %p959_p6 = scmp.lt.u32.totalorder %s951_s23, %s1278_s18 }
 0x33d   : > { %p953_p5 = pnand %p952_p4, %p1336_p11 }
 0x33e   : > { %p958_p3 = por %p957_p1, %p956_p9 }
 0x33f   : > { %p954_p7 = pneg %p953_p5 }
 0x340   : > { %p960_p12 = por %p959_p6, %p958_p3 }
 0x342   : > { %p961_p13 = pnand %p960_p12, %p954_p7 }
 0x344   : > { %964 = shalt.err (!%p961_p13)
}
 0x345   : > { %s1010_s17 = smov 256   ;;  %s1011_s15 = smov 512  }
 0x346   : > { %s1012_s12 = smov 16  }
 0x347   : > { %848 = dma.vmem_to_hbm [thread:$0]  (%p1336_p11), %s1273_s9, 512, %s1278_s18, %s710_s28, %s1010_s17, %s1011_s15, %s1012_s12  }
 0x348 PF: > { %s738_s20 = sand.u32 1, %s991_s24   ;;  %p1337_p8 = scmp.ne.s32.totalorder %s1334_s14, 0 }
 0x349   : > { %p1338_p10 = scmp.ge.s32.totalorder %s1003_s27, 2  ;;  %s739_s22 = scalar_lea.sflag [#allocation4], %s738_s20 }
 0x34b   : > { %p855_p0 = pnand %p1338_p10, %p1337_p8 }
 0x34d   : > { %986 = dma.done.wait (!%p855_p0), %s739_s22, 512  }
 0x34e   : > { %988 = vsyncadd (!%p855_p0), %s739_s22, 4294966784  ;;  %p20_p2 = scmp.ge.s32.totalorder %s1078_s30, 4   ;;  %s1339_s24 = smov %s995_s25 }
 0x34f   : > { %s1340_s25 = smov %s999_s26  ;;  %s1341_s26 = smov %s1090_s10 }
 0x350   : > { %s1342_s27 = smov %s1078_s30  ;;  %22 = sbr.rel (!%p20_p2) target bundleno = 5 (0x5), region = 93 }
 0x357   :  { %744 = vsyncpa [#allocation3], 1 }
 0x358   :  { %746 = vsyncpa [#allocation3 + $0x1], 1 }
 0x359   :  { %747 = vsyncpa [#allocation4], 1 }
 0x35a   :  { %749 = vsyncpa [#allocation4 + $0x1], 1 }

</bundles_post_ra>
